<compile_context>
chip_gen: v5e
topology: v5e:2x2
jax: 0.10.0
libtpu: 0.0.40
codegen_flags: <defaults>
</compile_context>

<pallas_src>
import jax
import jax.numpy as jnp
from jax import lax
from jax.experimental import pallas as pl
from jax.experimental.pallas import tpu as pltpu

_EPS = 1e-5


def _cdiv(a, b):
    return -(-a // b)


def _round_up(a, b):
    return _cdiv(a, b) * b


def _detect_num_partials():
    """One partial per TensorCore (2 on v7x, 1 on v5e/v6e)."""
    try:
        info = pltpu.get_tpu_info()
        for name in ("num_cores", "core_count", "cores_per_chip",
                     "num_tensorcores", "tensorcore_count"):
            v = getattr(info, name, None)
            if v:
                return max(1, int(v))
    except Exception:
        pass
    try:
        if "v7" in jax.devices()[0].device_kind.lower():
            return 2
    except Exception:
        pass
    return 1


def _make_ce_kernel(masked, num_partials, bpp, tile_rows, lanes, rows_in_last):
    ragged = rows_in_last < tile_rows  # static Python condition

    def kernel(*refs):
        if masked:
            out_ref, tgt_ref, mask_ref, psum_ref = refs
        else:
            out_ref, tgt_ref, psum_ref = refs
            mask_ref = None

        c = pl.program_id(0)
        i = pl.program_id(1)

        # Output block is resident across the inner "arbitrary" axis: use it
        # directly as the accumulator (no VMEM scratch, no copy-out).
        @pl.when(i == 0)
        def _():
            psum_ref[...] = jnp.zeros_like(psum_ref)

        o = out_ref[...].astype(jnp.float32)
        t = tgt_ref[...].astype(jnp.float32)
        loss = -t * jnp.log(o + _EPS)
        if masked:
            loss = loss * mask_ref[...].astype(jnp.float32)

        if ragged:
            # Only the globally-last block has rows past the real data; zero
            # them with a select so garbage/NaN from the partial DMA never
            # leaks into the sum.  rows_in_last is a static Python int.
            is_last = jnp.logical_and(c == num_partials - 1, i == bpp - 1)
            row = lax.broadcasted_iota(jnp.int32, loss.shape, 0)
            keep = jnp.logical_or(jnp.logical_not(is_last), row < rows_in_last)
            loss = jnp.where(keep, loss, 0.0)

        # Pure-VPU fold (tile_rows, lanes) -> (8, lanes); single vreg-add chain.
        psum_ref[...] += loss.reshape(-1, 8, lanes).sum(axis=0)

    return kernel


def cross_entropy_loss(output, target, mask=None, *,
                       num_partials=None,
                       target_block_elems=512 * 1024,
                       min_pallas_elems=1 << 16):
    """Pallas equivalent of the module's forward: mean(-target*log(output+1e-5)[*mask]).

    Pass narrow dtypes (bf16 output/target, int8/bf16 mask) directly — the
    kernel upcasts in VMEM, so HBM traffic scales with the input itemsize.
    Returns a scalar float32.
    """
    assert output.shape == target.shape, "output/target shape mismatch"
    if mask is not None:
        assert mask.shape == output.shape, "mask shape mismatch"

    total = int(output.size)

    def _xla_path():
        loss = -target.astype(jnp.float32) * jnp.log(output.astype(jnp.float32) + _EPS)
        if mask is not None:
            loss = loss * mask.astype(jnp.float32)
        return jnp.mean(loss)

    # Small inputs, or element counts we cannot reshape lane-dense for free,
    # are cheaper in plain XLA than paying fixed kernel/grid overhead.
    if total < min_pallas_elems or total % 128 != 0:
        return _xla_path()

    # Lane width: widest of {512, 256, 128} that gives a copy-free reshape.
    for lanes in (512, 256, 128):
        if total % lanes == 0:
            break
    rows = total // lanes

    if num_partials is None:
        num_partials = _detect_num_partials()
    num_partials = max(1, int(num_partials))

    # Row-block plan: ~target_block_elems elements per block, blocks split
    # evenly over partials, tile_rows re-tightened so row overshoot is < 8
    # rows per block (handled in-kernel, never materialized).
    tile_rows_target = max(8, (target_block_elems // lanes) // 8 * 8)
    while True:
        nblocks0 = max(1, _cdiv(rows, tile_rows_target))
        bpp = _cdiv(nblocks0, num_partials)
        num_blocks = bpp * num_partials
        tile_rows = max(8, _round_up(_cdiv(rows, num_blocks), 8))
        if num_partials == 1 or (num_blocks - 1) * tile_rows < rows:
            break
        num_partials = 1  # too little work to split; avoid fully-empty blocks
    rows_in_last = rows - (num_blocks - 1) * tile_rows

    out_2d = output.reshape(rows, lanes)   # copy-free: total % lanes == 0
    tgt_2d = target.reshape(rows, lanes)

    in_spec = pl.BlockSpec((tile_rows, lanes), lambda c, i: (c * bpp + i, 0))

    operands = [out_2d, tgt_2d]
    itemsizes = [out_2d.dtype.itemsize, tgt_2d.dtype.itemsize]
    in_specs = [in_spec, in_spec]
    if mask is not None:
        operands.append(mask.reshape(rows, lanes))
        itemsizes.append(mask.dtype.itemsize)
        in_specs.append(in_spec)

    kernel = _make_ce_kernel(mask is not None, num_partials, bpp, tile_rows,
                             lanes, rows_in_last)

    out_bytes = num_partials * 8 * lanes * 4
    cost = pl.CostEstimate(flops=5 * total, transcendentals=total,
                           bytes_accessed=int(total * sum(itemsizes) + out_bytes))

    # Double-buffered input tiles + resident output; leave headroom but stay
    # well within v7x's smaller (64 MiB physical per-TC) VMEM.
    vmem_limit = int(min(max(2 * tile_rows * lanes * sum(itemsizes)
                             + out_bytes + (4 << 20), 16 << 20), 48 << 20))

    if num_partials > 1:
        # Real 2-TensorCore split on v7x; inner reduction axis stays serial.
        dim_sem = (pltpu.CORE_PARALLEL, pltpu.ARBITRARY)
    else:
        dim_sem = (pltpu.ARBITRARY, pltpu.ARBITRARY)

    partials = pl.pallas_call(
        kernel,
        out_shape=jax.ShapeDtypeStruct((num_partials * 8, lanes), jnp.float32),
        grid_spec=pltpu.PrefetchScalarGridSpec(
            num_scalar_prefetch=0,
            grid=(num_partials, bpp),
            in_specs=in_specs,
            out_specs=pl.BlockSpec((8, lanes), lambda c, i: (c, 0)),
        ),
        compiler_params=pltpu.CompilerParams(
            dimension_semantics=dim_sem,
            vmem_limit_bytes=vmem_limit,
        ),
        cost_estimate=cost,
    )(*operands)

    # Single cross-lane reduction + mean, done exactly once, in the wrapper.
    return jnp.sum(partials) / jnp.float32(total)


def _reference(output, target, mask=None):
    loss = -target * jnp.log(output + _EPS)
    if mask is not None:
        loss = loss * mask
    return jnp.mean(loss)


if __name__ == "__main__":
    key = jax.random.PRNGKey(0)
    ks = jax.random.split(key, 9)

    # case 1: module-sized input (batch=2, 16x16 map), with & without mask.
    b, n = 2, 16 * 16
    output = jax.nn.sigmoid(jax.random.normal(ks[0], (b, n), jnp.float32))
    target = jax.nn.sigmoid(jax.random.normal(ks[1], (b, n), jnp.float32))
    mask = (jax.random.uniform(ks[2], (b, n)) > 0.3).astype(jnp.float32)

    # default dispatch -> small-input XLA fast path
    l_fast = cross_entropy_loss(output, target, mask)
    jax.block_until_ready(l_fast)
    assert jnp.allclose(l_fast, _reference(output, target, mask), rtol=1e-5, atol=1e-6)

    # force the Pallas path (rows=1 < 8 exercises the in-kernel ragged mask)
    l_nm = cross_entropy_loss(output, target, min_pallas_elems=0)
    jax.block_until_ready(l_nm)
    assert jnp.allclose(l_nm, _reference(output, target), rtol=1e-5, atol=1e-6), (
        l_nm, _reference(output, target))

    l_m = cross_entropy_loss(output, target, mask, min_pallas_elems=0)
    jax.block_until_ready(l_m)
    assert jnp.allclose(l_m, _reference(output, target, mask), rtol=1e-5, atol=1e-6), (
        l_m, _reference(output, target, mask))

    # case 2: larger map + bf16 mask (narrow dtype passed straight through);
    # small blocks force multi-step accumulation along the reduction axis.
    b2, n2 = 4, 64 * 64
    output2 = jax.nn.sigmoid(jax.random.normal(ks[3], (b2, n2), jnp.float32))
    target2 = jax.nn.sigmoid(jax.random.normal(ks[4], (b2, n2), jnp.float32))
    mask2 = (jax.random.uniform(ks[5], (b2, n2)) > 0.5).astype(jnp.bfloat16)

    l2 = cross_entropy_loss(output2, target2, mask2,
                            min_pallas_elems=0, target_block_elems=8 * 512)
    jax.block_until_ready(l2)
    ref2 = _reference(output2, target2, mask2.astype(jnp.float32))
    assert jnp.allclose(l2, ref2, rtol=1e-4, atol=1e-5), (l2, ref2)

    # case 3: rows (= 11) not a multiple of the 8-row sublane tile nor of
    # tile_rows: exercises in-kernel ragged masking with multiple grid steps.
    b3, n3 = 2, 44 * 64
    output3 = jax.nn.sigmoid(jax.random.normal(ks[6], (b3, n3), jnp.float32))
    target3 = jax.nn.sigmoid(jax.random.normal(ks[7], (b3, n3), jnp.float32))
    l3 = cross_entropy_loss(output3, target3, min_pallas_elems=0,
                            target_block_elems=8 * 512)
    jax.block_until_ready(l3)
    assert jnp.allclose(l3, _reference(output3, target3), rtol=1e-5, atol=1e-6), (
        l3, _reference(output3, target3))

    # case 4: element count not a multiple of 128 -> XLA fallback path.
    b4, n4 = 2, 15 * 15
    output4 = jax.nn.sigmoid(jax.random.normal(ks[8], (b4, n4), jnp.float32))
    target4 = jax.nn.sigmoid(jax.random.normal(ks[0], (b4, n4), jnp.float32))
    l4 = cross_entropy_loss(output4, target4)
    jax.block_until_ready(l4)
    assert jnp.allclose(l4, _reference(output4, target4), rtol=1e-5, atol=1e-6)

    print("KERNEL_OK")
</pallas_src>

<mosaic_0001>
module attributes {stable_mosaic.version = 11 : i64} {
  func.func @kernel(%arg0: i32, %arg1: i32, %arg2: memref<8x512xf32, #tpu.memory_space<vmem>>, %arg3: memref<8x512xf32, #tpu.memory_space<vmem>>, %arg4: memref<8x512xf32, #tpu.memory_space<vmem>>) attributes {dimension_semantics = [#tpu.dimension_semantics<arbitrary>, #tpu.dimension_semantics<arbitrary>], iteration_bounds = array<i64: 1, 1>, scalar_prefetch = 0 : i64, scratch_operands = 0 : i64, tpu.core_type = #tpu.core_type<tc>, window_params = [{transform_indices = @transform_0, window_bounds = array<i64: 8, 512>}, {transform_indices = @transform_1, window_bounds = array<i64: 8, 512>}, {transform_indices = @transform_2, window_bounds = array<i64: 8, 512>}]} {
    %c0_i32 = arith.constant 0 : i32
    %0 = arith.cmpi eq, %arg1, %c0_i32 : i32
    %1 = arith.extui %0 : i1 to i32
    %c0_i32_0 = arith.constant 0 : i32
    %2 = arith.cmpi ne, %1, %c0_i32_0 : i32
    scf.if %2 {
      %cst_13 = arith.constant 0.000000e+00 : f32
      %27 = vector.broadcast %cst_13 : f32 to vector<8x512xf32>
      %c0_14 = arith.constant 0 : index
      %c0_15 = arith.constant 0 : index
      %28 = vector.load %arg4[%c0_14, %c0_15] : memref<8x512xf32, #tpu.memory_space<vmem>>, vector<8x512xf32>
      tpu.vector_store %arg4[%c0_14, %c0_15], %27 {strides = array<i32>} : memref<8x512xf32, #tpu.memory_space<vmem>>, vector<8x512xf32>,
    } else {
    }
    %c0 = arith.constant 0 : index
    %c0_1 = arith.constant 0 : index
    %3 = vector.load %arg2[%c0, %c0_1] : memref<8x512xf32, #tpu.memory_space<vmem>>, vector<8x512xf32>
    %c0_2 = arith.constant 0 : index
    %c0_3 = arith.constant 0 : index
    %4 = vector.load %arg3[%c0_2, %c0_3] : memref<8x512xf32, #tpu.memory_space<vmem>>, vector<8x512xf32>
    %cst = arith.constant 0.000000e+00 : f32
    %5 = vector.broadcast %cst : f32 to vector<8x512xf32>
    %6 = arith.subf %5, %4 : vector<8x512xf32>
    %cst_4 = arith.constant 9.99999974E-6 : f32
    %7 = vector.broadcast %cst_4 : f32 to vector<8x512xf32>
    %8 = arith.addf %3, %7 : vector<8x512xf32>
    %9 = math.log %8 : vector<8x512xf32>
    %10 = arith.mulf %6, %9 : vector<8x512xf32>
    %c0_i32_5 = arith.constant 0 : i32
    %11 = arith.cmpi eq, %arg0, %c0_i32_5 : i32
    %c0_i32_6 = arith.constant 0 : i32
    %12 = arith.cmpi eq, %arg1, %c0_i32_6 : i32
    %13 = arith.andi %11, %12 : i1
    %14 = tpu.iota {dimensions = array<i32: 0>} : vector<8x512xi32>
    %true = arith.constant true
    %15 = arith.xori %13, %true : i1
    %c1_i32 = arith.constant 1 : i32
    %16 = vector.broadcast %c1_i32 : i32 to vector<8x512xi32>
    %17 = arith.cmpi slt, %14, %16 : vector<8x512xi32>
    %18 = vector.broadcast %15 : i1 to vector<8x512xi1>
    %19 = arith.ori %18, %17 : vector<8x512xi1>
    %cst_7 = arith.constant 0.000000e+00 : f32
    %20 = vector.broadcast %cst_7 : f32 to vector<8x512xf32>
    %21 = arith.select %19, %10, %20 : vector<8x512xi1>, vector<8x512xf32>
    %c0_8 = arith.constant 0 : index
    %c0_9 = arith.constant 0 : index
    %22 = vector.load %arg4[%c0_8, %c0_9] : memref<8x512xf32, #tpu.memory_space<vmem>>, vector<8x512xf32>
    %23 = vector.shape_cast %21 : vector<8x512xf32> to vector<1x8x512xf32>
    %cst_10 = arith.constant dense<0.000000e+00> : vector<8x512xf32>
    %24 = vector.multi_reduction <add>, %23, %cst_10 [0] : vector<1x8x512xf32> to vector<8x512xf32>
    %25 = arith.addf %22, %24 : vector<8x512xf32>
    %c0_11 = arith.constant 0 : index
    %c0_12 = arith.constant 0 : index
    %26 = vector.load %arg4[%c0_11, %c0_12] : memref<8x512xf32, #tpu.memory_space<vmem>>, vector<8x512xf32>
    tpu.vector_store %arg4[%c0_11, %c0_12], %25 {strides = array<i32>} : memref<8x512xf32, #tpu.memory_space<vmem>>, vector<8x512xf32>,
    return
  }
  func.func @transform_0(%arg0: i32, %arg1: i32) -> (i32, i32) {
    %c1_i32 = arith.constant 1 : i32
    %0 = arith.muli %arg0, %c1_i32 : i32
    %1 = arith.addi %0, %arg1 : i32
    %c0_i32 = arith.constant 0 : i32
    %c0_i32_0 = arith.constant 0 : i32
    return %1, %c0_i32 : i32, i32
  }
  func.func @transform_1(%arg0: i32, %arg1: i32) -> (i32, i32) {
    %c1_i32 = arith.constant 1 : i32
    %0 = arith.muli %arg0, %c1_i32 : i32
    %1 = arith.addi %0, %arg1 : i32
    %c0_i32 = arith.constant 0 : i32
    %c0_i32_0 = arith.constant 0 : i32
    return %1, %c0_i32 : i32, i32
  }
  func.func @transform_2(%arg0: i32, %arg1: i32) -> (i32, i32) {
    %c0_i32 = arith.constant 0 : i32
    %c0_i32_0 = arith.constant 0 : i32
    return %arg0, %c0_i32 : i32, i32
  }
}

</mosaic_0001>

<bundles_post_ra>
// kernel: tpu_custom_call.1
= control target key start
LH: loop header
LB: loop body
LE: loop exit
PB: predicated region body
PF: predicated region fallthrough
CT: control target
= control target key end

     0   :  { %7 = vsyncpa [#allocation3], 0  ;;  %s343_s0 = inlined_call_operand.hbm [shape: f32[1,512], index: 0, kind: input, shape index: {}]   ;;  %s344_s1 = inlined_call_operand.hbm [shape: f32[1,512], index: 1, kind: input, shape index: {}]   ;;  %s345_s2 = inlined_call_operand.hbm [shape: f32[8,512], index: 2, kind: output, shape index: {}]  }
   0x1   :  { %8 = vsyncpa [#allocation6], 0 }
   0x2   :  { %9 = vsyncpa [#allocation4], 0 }
   0x3   :  { %18 = vsyncadd [#allocation3], 448  ;;  %s23_s11 = sshll.u32 %s343_s0, 4  ;;  %s314_s12 = smov [#allocation2]   ;;  %s24_s11 = int_to_ptr.hbm [resolvable:$true] %s23_s11 }
   0x4   :  { %s25_s13 = sshll.u32 %s314_s12, 4  ;;  %s315_s14 = smov 64   ;;  %s26_s13 = int_to_ptr.vmem [resolvable:$true] %s25_s13 }
   0x5   :  { %s316_s15 = smov 4  }
   0x6   :  { %31 = dma.hbm_to_vmem [thread:$0]  %s24_s11, 64, %s26_s13, [#allocation3], %s315_s14, %s315_s14, %s316_s15  }
   0x7   :  { %40 = vsyncadd [#allocation6], 448  ;;  %s45_s18 = sshll.u32 %s344_s1, 4  ;;  %s317_s19 = smov [#allocation5]   ;;  %s46_s18 = int_to_ptr.hbm [resolvable:$true] %s45_s18 }
   0x8   :  { %s47_s20 = sshll.u32 %s317_s19, 4  ;;  %s48_s20 = int_to_ptr.vmem [resolvable:$true] %s47_s20 }
   0x9   :  { %53 = dma.hbm_to_vmem [thread:$0]  %s46_s18, 64, %s48_s20, [#allocation6], %s315_s14, %s315_s14, %s316_s15  }
   0xa   :  { %308 = dma.done.wait [#allocation3], 512  }
   0xb   :  { %309 = vsyncadd [#allocation3], 4294966784 }
   0xc   :  { %310 = dma.done.wait [#allocation6], 512  }
   0xd   :  { %311 = vsyncadd [#allocation6], 4294966784  ;;  %v78_v0 = vld [vmem:[#allocation2] sm:$0xf]  ;;  %v79_v1 = vld [vmem:[#allocation2 + $0x4] sm:$0xf]  ;;  %v137_v55 = vlaneseq }
   0xe   :  { %v102_v2 = vadd.f32 1e-05, %v78_v0  ;;  %v103_v3 = vadd.f32 1e-05, %v79_v1  ;;  %v80_v4 = vld [vmem:[#allocation2 + $0x8] sm:$0xf] }
   0xf   :  { %v104_v5 = vadd.f32 1e-05, %v80_v4  ;;  %v81_v6 = vld [vmem:[#allocation2 + $0xc] sm:$0xf]  ;;  %v86_v8 = vld [vmem:[#allocation5] sm:$0xf] }
  0x10   :  { %220 = vlog2.f32 %v102_v2  ;;  %v105_v7 = vadd.f32 1e-05, %v81_v6  ;;  %v87_v9 = vld [vmem:[#allocation5 + $0x4] sm:$0xf]  ;;  %v82_v10 = vld [vmem:[#allocation2 + $0x10] sm:$0xf] }
  0x11   :  { %222 = vlog2.f32 %v103_v3  ;;  %v88_v11 = vld [vmem:[#allocation5 + $0x8] sm:$0xf]  ;;  %v106_v12 = vadd.f32 1e-05, %v82_v10  ;;  %v83_v13 = vld [vmem:[#allocation2 + $0x14] sm:$0xf] }
  0x12   :  { %224 = vlog2.f32 %v104_v5  ;;  %v107_v14 = vadd.f32 1e-05, %v83_v13  ;;  %v84_v15 = vld [vmem:[#allocation2 + $0x18] sm:$0xf]  ;;  %v94_v16 = vsub.f32 0.0, %v86_v8  ;;  %v95_v20 = vsub.f32 0.0, %v87_v9 }
  0x13   :  { %226 = vlog2.f32 %v105_v7  ;;  %v89_v17 = vld [vmem:[#allocation5 + $0xc] sm:$0xf]  ;;  %v108_v18 = vadd.f32 1e-05, %v84_v15  ;;  %v96_v21 = vsub.f32 0.0, %v88_v11  ;;  %v138_v57 = vshrl.u32 %v137_v55, 7 }
  0x14   :  { %228 = vlog2.f32 %v106_v12  ;;  %v85_v22 = vld [vmem:[#allocation2 + $0x1c] sm:$0xf]  ;;  %v90_v25 = vld [vmem:[#allocation5 + $0x10] sm:$0xf]  ;;  %v97_v29 = vsub.f32 0.0, %v89_v17  ;;  %s318_s0 = smov [#allocation7]  }
  0x15   :  { %230 = vlog2.f32 %v107_v14  ;;  %v109_v26 = vadd.f32 1e-05, %v85_v22  ;;  %v91_v30 = vld [vmem:[#allocation5 + $0x14] sm:$0xf]  ;;  %v92_v34 = vld [vmem:[#allocation5 + $0x18] sm:$0xf] }
  0x16   :  { %v221_v19 = vpop.eup %220  ;;  %232 = vlog2.f32 %v108_v18  ;;  %v98_v37 = vsub.f32 0.0, %v90_v25  ;;  %v99_v40 = vsub.f32 0.0, %v91_v30  ;;  %v93_v41 = vld [vmem:[#allocation5 + $0x1c] sm:$0xf]  ;;  %v100_v45 = vsub.f32 0.0, %v92_v34  ;;  %s201_s1 = sshll.u32 %s318_s0, 4  ;;  %s202_s1 = int_to_ptr.vmem [resolvable:$true] %s201_s1 }
  0x17   :  { %v223_v23 = vpop.eup %222  ;;  %v111_v24 = vmul.f32 0.6931472, %v221_v19  ;;  %234 = vlog2.f32 %v109_v26  ;;  %v101_v50 = vsub.f32 0.0, %v93_v41  ;;  %vm140_vm0 = vcmp.lt.s32.totalorder %v138_v57, 1  ;;  %s203_s23 = sshll.u32 %s345_s2, 4  ;;  %s204_s23 = int_to_ptr.hbm [resolvable:$true] %s203_s23 }
  0x18   :  { %v225_v27 = vpop.eup %224  ;;  %v113_v28 = vmul.f32 0.6931472, %v223_v23 }
  0x19   :  { %v227_v31 = vpop.eup %226  ;;  %v126_v32 = vmul.f32 %v111_v24, %v94_v16  ;;  %v115_v33 = vmul.f32 0.6931472, %v225_v27 }
  0x1a   :  { %v127_v35 = vmul.f32 %v113_v28, %v95_v20  ;;  %v117_v36 = vmul.f32 0.6931472, %v227_v31  ;;  %v229_v38 = vpop.eup %228 }
  0x1b   :  { %153 = vst [vmem:[#allocation1] ss:$9 sm:$0xff] %v126_v32  ;;  %v128_v39 = vmul.f32 %v115_v33, %v96_v21  ;;  %v231_v42 = vpop.eup %230  ;;  %v119_v44 = vmul.f32 0.6931472, %v229_v38 }
  0x1c   :  { %155 = vst [vmem:[#allocation1 + $0x1] ss:$9 sm:$0xff] %v127_v35  ;;  %v129_v43 = vmul.f32 %v117_v36, %v97_v29  ;;  %v233_v46 = vpop.eup %232  ;;  %v121_v47 = vmul.f32 0.6931472, %v231_v42 }
  0x1d   :  { %157 = vst [vmem:[#allocation1 + $0x2] ss:$9 sm:$0xff] %v128_v39  ;;  %v130_v48 = vmul.f32 %v119_v44, %v98_v37  ;;  %v123_v49 = vmul.f32 0.6931472, %v233_v46  ;;  %v235_v51 = vpop.eup %234 }
  0x1e   :  { %159 = vst [vmem:[#allocation1 + $0x3] ss:$9 sm:$0xff] %v129_v43  ;;  %v131_v52 = vmul.f32 %v121_v47, %v99_v40  ;;  %v125_v54 = vmul.f32 0.6931472, %v235_v51 }
  0x1f   :  { %161 = vst [vmem:[#allocation1 + $0x4] ss:$9 sm:$0xff] %v130_v48  ;;  %v132_v53 = vmul.f32 %v123_v49, %v100_v45 }
  0x20   :  { %163 = vst [vmem:[#allocation1 + $0x5] ss:$9 sm:$0xff] %v131_v52  ;;  %v133_v56 = vmul.f32 %v125_v54, %v101_v50 }
  0x21   :  { %165 = vst [vmem:[#allocation1 + $0x6] ss:$9 sm:$0xff] %v132_v53 }
  0x22   :  { %167 = vst [vmem:[#allocation1 + $0x7] ss:$9 sm:$0xff] %v133_v56 }
  0x29   :  { %v168_v58 = vld [vmem:[#allocation1] sm:$0xff]  ;;  %v169_v59 = vld [vmem:[#allocation1 + $0x9] sm:$0xff]  ;;  %v170_v60 = vld [vmem:[#allocation1 + $0x12] sm:$0xff] }
  0x2a   :  { %v176_v61 = vsel %vm140_vm0, %v168_v58, 0.0  ;;  %v177_v62 = vsel %vm140_vm0, %v169_v59, 0.0  ;;  %v178_v63 = vsel %vm140_vm0, %v170_v60, 0.0  ;;  %v171_v0 = vld [vmem:[#allocation1 + $0x1b] sm:$0xff] }
  0x2b   :  { %v179_v1 = vsel %vm140_vm0, %v171_v0, 0.0  ;;  %192 = vst [vmem:[#allocation7] sm:$0xff] %v176_v61 }
  0x2c   :  { %193 = vst [vmem:[#allocation7 + $0x8] sm:$0xff] %v177_v62 }
  0x2d   :  { %194 = vst [vmem:[#allocation7 + $0x10] sm:$0xff] %v178_v63 }
  0x2e   :  { %195 = vst [vmem:[#allocation7 + $0x18] sm:$0xff] %v179_v1 }
  0x2f   :  { %206 = dma.vmem_to_hbm [thread:$0]  %s202_s1, 512, %s204_s23, [#allocation4]  }
  0x30   :  { %312 = dma.done.wait [#allocation4], 512  }
  0x31   :  { %313 = vsyncadd [#allocation4], 4294966784 }
  0x32   :  { %211 = vsyncpa [#allocation3], 1 }
  0x33   :  { %212 = vsyncpa [#allocation6], 1 }
  0x34   :  { %213 = vsyncpa [#allocation4], 1 }

</bundles_post_ra>
